<compile_context>
chip_gen: v7x
topology: tpu7x:2x2x1
jax: 0.10.0
libtpu: 0.0.40
codegen_flags: <defaults>
</compile_context>

<pallas_src>
import functools

import jax
import jax.numpy as jnp
from jax.experimental import pallas as pl
from jax.experimental.pallas import tpu as pltpu

LANE = 128  # TPU lane width
SUBLANE = 8


def _round_up(n, m):
    return ((n + m - 1) // m) * m


# ----------------------------------------------------------------------------- kernel ----
def mlp_kernel(x_ref, w1_ref, b1_ref, w2_ref, b2_ref, w3_ref, b3_ref,
               w4_ref, b4_ref, out_ref):
    # hidden_1 + ReLU (bf16 operands, f32 accumulation / activation)
    h = jnp.dot(x_ref[...], w1_ref[...], preferred_element_type=jnp.float32)
    h = jnp.maximum(h + b1_ref[...], 0.0)
    # hidden_2 + ReLU
    h = jnp.dot(h.astype(jnp.bfloat16), w2_ref[...], preferred_element_type=jnp.float32)
    h = jnp.maximum(h + b2_ref[...], 0.0)
    # hidden_3 + ReLU
    h = jnp.dot(h.astype(jnp.bfloat16), w3_ref[...], preferred_element_type=jnp.float32)
    h = jnp.maximum(h + b3_ref[...], 0.0)
    # output (no activation) -- last dim is the true out_dim (full array dim)
    o = jnp.dot(h.astype(jnp.bfloat16), w4_ref[...], preferred_element_type=jnp.float32)
    out_ref[...] = (o + b4_ref[...]).astype(out_ref.dtype)


# ------------------------------------------------------------------- param preparation ----
def prepare_params(params):
    """One-time preprocessing: pad hidden dims to lane multiples, cast weights to bf16.

    params: dict of transposed weights w{i}: (in, out) f32 and biases b{i}: (1, out) f32.
    Returns a new dict of padded bf16 weights and padded f32 biases, ready for the kernel.
    """
    w1, b1 = params["w1"], params["b1"]
    w2, b2 = params["w2"], params["b2"]
    w3, b3 = params["w3"], params["b3"]
    w4, b4 = params["w4"], params["b4"]
    in_dim = w1.shape[0]
    H, H2, out_dim = w1.shape[1], w3.shape[1], w4.shape[1]

    h_p = _round_up(H, LANE)
    h2_p = _round_up(H2, LANE)

    def pad2(a, r, c):
        return jnp.pad(a, ((0, r - a.shape[0]), (0, c - a.shape[1])))

    return {
        # weights: padded on hidden dims only, pre-cast to bf16 (f32 accumulation in-kernel)
        "w1": pad2(w1, in_dim, h_p).astype(jnp.bfloat16),
        "w2": pad2(w2, h_p, h_p).astype(jnp.bfloat16),
        "w3": pad2(w3, h_p, h2_p).astype(jnp.bfloat16),
        "w4": pad2(w4, h2_p, out_dim).astype(jnp.bfloat16),
        # biases stay f32 (bias-add / ReLU done in f32)
        "b1": pad2(b1, 1, h_p),
        "b2": pad2(b2, 1, h_p),
        "b3": pad2(b3, 1, h2_p),
        "b4": b4,
    }


def _pick_tile(B):
    """Batch tile: 1 tile for small B, >=2 tiles for moderate B (v7x 2-TC), 1024 for large."""
    b_min = _round_up(B, SUBLANE)
    if b_min <= 512:
        return b_min                                   # single tile, minimal overhead
    if b_min <= 2048:
        return _round_up(pl.cdiv(B, 2), SUBLANE)       # 2 tiles -> both v7x TCs busy
    return 1024                                        # large B: amortize per-step overhead


def _vmem_budget_bytes(prepared, tile_b, in_dim, out_dim):
    w_bytes = sum(int(a.size) * a.dtype.itemsize for a in prepared.values())
    io_bytes = 2 * (tile_b * max(in_dim, LANE) * 2 + tile_b * max(out_dim, LANE) * 4)
    h_p = prepared["w2"].shape[0]
    scratch = 4 * tile_b * h_p * 4            # headroom for f32 intermediates
    total = int(1.5 * (w_bytes + io_bytes + scratch)) + (4 << 20)
    return min(total, 100 << 20)


# ------------------------------------------------------------------------------ forward ----
def neural_network_forward(x, prepared):
    """Fused MLP forward.  x: (B, input_size) f32.  prepared: output of prepare_params."""
    B, in_dim = x.shape
    out_dim = prepared["w4"].shape[1]

    tile_b = _pick_tile(B)
    b_pad = _round_up(B, tile_b)
    # Single pass over x: zero-pad ragged batch rows and cast operands to bf16.
    xp = jnp.pad(x, ((0, b_pad - B), (0, 0))).astype(jnp.bfloat16)
    grid = (b_pad // tile_b,)

    # Weights/biases: whole-array VMEM residents -> no per-step DMA, no double buffering.
    resident = pl.BlockSpec(memory_space=pltpu.MemorySpace.VMEM)

    out_padded = pl.pallas_call(
        mlp_kernel,
        out_shape=jax.ShapeDtypeStruct((b_pad, out_dim), jnp.float32),
        grid_spec=pltpu.PrefetchScalarGridSpec(
            num_scalar_prefetch=0,
            grid=grid,
            in_specs=[
                pl.BlockSpec((tile_b, in_dim), lambda i: (i, 0)),  # x tile (pipelined)
                resident, resident,    # w1, b1
                resident, resident,    # w2, b2
                resident, resident,    # w3, b3
                resident, resident,    # w4, b4
            ],
            out_specs=pl.BlockSpec((tile_b, out_dim), lambda i: (i, 0)),
        ),
        compiler_params=pltpu.CompilerParams(
            dimension_semantics=("parallel",),
            vmem_limit_bytes=_vmem_budget_bytes(prepared, tile_b, in_dim, out_dim)),
    )(xp, prepared["w1"], prepared["b1"], prepared["w2"], prepared["b2"],
      prepared["w3"], prepared["b3"], prepared["w4"], prepared["b4"])

    # TODO(synk): for hidden_size >= ~2048 the resident-f32->bf16 weights still grow as
    # O(h^2); switch w2/w3 to K-tiled BlockSpecs before they outgrow v7x's 64 MiB VMEM.
    return out_padded[:B]


# ------------------------------------------------------------------------------- helpers ----
def init_params(key, input_size, hidden_size, output_size):
    """Deterministic init mimicking torch.nn.Linear default (U[-1/sqrt(fan_in), +])."""
    hidden_size_2 = int(hidden_size / 2)
    dims = [(input_size, hidden_size),
            (hidden_size, hidden_size),
            (hidden_size, hidden_size_2),
            (hidden_size_2, output_size)]
    params = {}
    for li, (fan_in, fan_out) in enumerate(dims, start=1):
        key, kw, kb = jax.random.split(key, 3)
        bound = 1.0 / (fan_in ** 0.5)
        # stored already transposed: (in, out)
        params[f"w{li}"] = jax.random.uniform(kw, (fan_in, fan_out),
                                              jnp.float32, -bound, bound)
        params[f"b{li}"] = jax.random.uniform(kb, (1, fan_out),
                                              jnp.float32, -bound, bound)
    return params


def reference_forward(x, p):
    """Pure-JAX reference emulating bf16 operands with f32 accumulation."""
    def lin(h, w, b):
        hb = h.astype(jnp.bfloat16).astype(jnp.float32)
        wb = w.astype(jnp.bfloat16).astype(jnp.float32)
        return jnp.dot(hb, wb) + b
    h = jnp.maximum(lin(x, p["w1"], p["b1"]), 0.0)
    h = jnp.maximum(lin(h, p["w2"], p["b2"]), 0.0)
    h = jnp.maximum(lin(h, p["w3"], p["b3"]), 0.0)
    return lin(h, p["w4"], p["b4"])


if __name__ == "__main__":
    input_size, hidden_size, output_size = 32, 32, 4
    batch = 16

    key = jax.random.PRNGKey(0)
    key, kx = jax.random.split(key)
    x = jax.random.normal(kx, (batch, input_size), jnp.float32)
    params = init_params(key, input_size, hidden_size, output_size)

    prepared = prepare_params(params)                 # one-time pad + bf16 cast
    fwd = jax.jit(neural_network_forward)

    out = fwd(x, prepared)
    out = jax.block_until_ready(out)

    ref = reference_forward(x, params)
    assert out.shape == (batch, output_size)
    assert jnp.allclose(out, ref, atol=1e-4, rtol=1e-4), \
        f"max abs err {jnp.max(jnp.abs(out - ref))}"
    print("KERNEL_OK")
</pallas_src>

<mosaic_0001>
module attributes {stable_mosaic.version = 11 : i64} {
  func.func @mlp_kernel(%arg0: i32, %arg1: memref<16x32xbf16, #tpu.memory_space<vmem>>, %arg2: memref<32x128xbf16, #tpu.memory_space<vmem>>, %arg3: memref<1x128xf32, #tpu.memory_space<vmem>>, %arg4: memref<128x128xbf16, #tpu.memory_space<vmem>>, %arg5: memref<1x128xf32, #tpu.memory_space<vmem>>, %arg6: memref<128x128xbf16, #tpu.memory_space<vmem>>, %arg7: memref<1x128xf32, #tpu.memory_space<vmem>>, %arg8: memref<128x4xbf16, #tpu.memory_space<vmem>>, %arg9: memref<1x4xf32, #tpu.memory_space<vmem>>, %arg10: memref<16x4xf32, #tpu.memory_space<vmem>>) attributes {dimension_semantics = [#tpu.dimension_semantics<parallel>], iteration_bounds = array<i64: 1>, scalar_prefetch = 0 : i64, scratch_operands = 0 : i64, tpu.core_type = #tpu.core_type<tc>, window_params = [{transform_indices = @transform_0, window_bounds = array<i64: 16, 32>}, {pipeline_mode = #tpu.pipeline_mode<synchronous>, transform_indices = @transform_1, window_bounds = array<i64: 32, 128>}, {pipeline_mode = #tpu.pipeline_mode<synchronous>, transform_indices = @transform_2, window_bounds = array<i64: 1, 128>}, {pipeline_mode = #tpu.pipeline_mode<synchronous>, transform_indices = @transform_3, window_bounds = array<i64: 128, 128>}, {pipeline_mode = #tpu.pipeline_mode<synchronous>, transform_indices = @transform_4, window_bounds = array<i64: 1, 128>}, {pipeline_mode = #tpu.pipeline_mode<synchronous>, transform_indices = @transform_5, window_bounds = array<i64: 128, 128>}, {pipeline_mode = #tpu.pipeline_mode<synchronous>, transform_indices = @transform_6, window_bounds = array<i64: 1, 128>}, {pipeline_mode = #tpu.pipeline_mode<synchronous>, transform_indices = @transform_7, window_bounds = array<i64: 128, 4>}, {pipeline_mode = #tpu.pipeline_mode<synchronous>, transform_indices = @transform_8, window_bounds = array<i64: 1, 4>}, {transform_indices = @transform_9, window_bounds = array<i64: 16, 4>}]} {
    %c0 = arith.constant 0 : index
    %c0_0 = arith.constant 0 : index
    %0 = vector.load %arg1[%c0, %c0_0] : memref<16x32xbf16, #tpu.memory_space<vmem>>, vector<16x32xbf16>
    %c0_1 = arith.constant 0 : index
    %c0_2 = arith.constant 0 : index
    %1 = vector.load %arg2[%c0_1, %c0_2] : memref<32x128xbf16, #tpu.memory_space<vmem>>, vector<32x128xbf16>
    %cst = arith.constant dense<0.000000e+00> : vector<16x128xf32>
    %2 = tpu.matmul %0, %1, %cst {dimension_numbers = #tpu.dot_dimension_numbers<[1], [0], [0], [1], [0, 0, 1, 1], [], []>} : vector<16x32xbf16>, vector<32x128xbf16>, vector<16x128xf32> -> vector<16x128xf32>
    %c0_3 = arith.constant 0 : index
    %c0_4 = arith.constant 0 : index
    %3 = vector.load %arg3[%c0_3, %c0_4] : memref<1x128xf32, #tpu.memory_space<vmem>>, vector<1x128xf32>
    %4 = vector.broadcast %3 : vector<1x128xf32> to vector<16x128xf32>
    %5 = arith.addf %2, %4 : vector<16x128xf32>
    %cst_5 = arith.constant 0.000000e+00 : f32
    %6 = vector.broadcast %cst_5 : f32 to vector<16x128xf32>
    %7 = arith.maximumf %5, %6 : vector<16x128xf32>
    %8 = arith.truncf %7 : vector<16x128xf32> to vector<16x128xbf16>
    %c0_6 = arith.constant 0 : index
    %c0_7 = arith.constant 0 : index
    %9 = vector.load %arg4[%c0_6, %c0_7] : memref<128x128xbf16, #tpu.memory_space<vmem>>, vector<128x128xbf16>
    %cst_8 = arith.constant dense<0.000000e+00> : vector<16x128xf32>
    %10 = tpu.matmul %8, %9, %cst_8 {dimension_numbers = #tpu.dot_dimension_numbers<[1], [0], [0], [1], [0, 0, 1, 1], [], []>} : vector<16x128xbf16>, vector<128x128xbf16>, vector<16x128xf32> -> vector<16x128xf32>
    %c0_9 = arith.constant 0 : index
    %c0_10 = arith.constant 0 : index
    %11 = vector.load %arg5[%c0_9, %c0_10] : memref<1x128xf32, #tpu.memory_space<vmem>>, vector<1x128xf32>
    %12 = vector.broadcast %11 : vector<1x128xf32> to vector<16x128xf32>
    %13 = arith.addf %10, %12 : vector<16x128xf32>
    %cst_11 = arith.constant 0.000000e+00 : f32
    %14 = vector.broadcast %cst_11 : f32 to vector<16x128xf32>
    %15 = arith.maximumf %13, %14 : vector<16x128xf32>
    %16 = arith.truncf %15 : vector<16x128xf32> to vector<16x128xbf16>
    %c0_12 = arith.constant 0 : index
    %c0_13 = arith.constant 0 : index
    %17 = vector.load %arg6[%c0_12, %c0_13] : memref<128x128xbf16, #tpu.memory_space<vmem>>, vector<128x128xbf16>
    %cst_14 = arith.constant dense<0.000000e+00> : vector<16x128xf32>
    %18 = tpu.matmul %16, %17, %cst_14 {dimension_numbers = #tpu.dot_dimension_numbers<[1], [0], [0], [1], [0, 0, 1, 1], [], []>} : vector<16x128xbf16>, vector<128x128xbf16>, vector<16x128xf32> -> vector<16x128xf32>
    %c0_15 = arith.constant 0 : index
    %c0_16 = arith.constant 0 : index
    %19 = vector.load %arg7[%c0_15, %c0_16] : memref<1x128xf32, #tpu.memory_space<vmem>>, vector<1x128xf32>
    %20 = vector.broadcast %19 : vector<1x128xf32> to vector<16x128xf32>
    %21 = arith.addf %18, %20 : vector<16x128xf32>
    %cst_17 = arith.constant 0.000000e+00 : f32
    %22 = vector.broadcast %cst_17 : f32 to vector<16x128xf32>
    %23 = arith.maximumf %21, %22 : vector<16x128xf32>
    %24 = arith.truncf %23 : vector<16x128xf32> to vector<16x128xbf16>
    %c0_18 = arith.constant 0 : index
    %c0_19 = arith.constant 0 : index
    %25 = vector.load %arg8[%c0_18, %c0_19] : memref<128x4xbf16, #tpu.memory_space<vmem>>, vector<128x4xbf16>
    %cst_20 = arith.constant dense<0.000000e+00> : vector<16x4xf32>
    %26 = tpu.matmul %24, %25, %cst_20 {dimension_numbers = #tpu.dot_dimension_numbers<[1], [0], [0], [1], [0, 0, 1, 1], [], []>} : vector<16x128xbf16>, vector<128x4xbf16>, vector<16x4xf32> -> vector<16x4xf32>
    %c0_21 = arith.constant 0 : index
    %c0_22 = arith.constant 0 : index
    %27 = vector.load %arg9[%c0_21, %c0_22] : memref<1x4xf32, #tpu.memory_space<vmem>>, vector<1x4xf32>
    %28 = vector.broadcast %27 : vector<1x4xf32> to vector<16x4xf32>
    %29 = arith.addf %26, %28 : vector<16x4xf32>
    %c0_23 = arith.constant 0 : index
    %c0_24 = arith.constant 0 : index
    %30 = vector.load %arg10[%c0_23, %c0_24] : memref<16x4xf32, #tpu.memory_space<vmem>>, vector<16x4xf32>
    tpu.vector_store %arg10[%c0_23, %c0_24], %29 {strides = array<i32>} : memref<16x4xf32, #tpu.memory_space<vmem>>, vector<16x4xf32>,
    return
  }
  func.func @transform_0(%arg0: i32) -> (i32, i32) {
    %c0_i32 = arith.constant 0 : i32
    %c0_i32_0 = arith.constant 0 : i32
    return %arg0, %c0_i32 : i32, i32
  }
  func.func @transform_1(%arg0: i32) -> (i32, i32) {
    %c0_i32 = arith.constant 0 : i32
    %c0_i32_0 = arith.constant 0 : i32
    %c0_i32_1 = arith.constant 0 : i32
    return %c0_i32, %c0_i32_0 : i32, i32
  }
  func.func @transform_2(%arg0: i32) -> (i32, i32) {
    %c0_i32 = arith.constant 0 : i32
    %c0_i32_0 = arith.constant 0 : i32
    %c0_i32_1 = arith.constant 0 : i32
    return %c0_i32, %c0_i32_0 : i32, i32
  }
  func.func @transform_3(%arg0: i32) -> (i32, i32) {
    %c0_i32 = arith.constant 0 : i32
    %c0_i32_0 = arith.constant 0 : i32
    %c0_i32_1 = arith.constant 0 : i32
    return %c0_i32, %c0_i32_0 : i32, i32
  }
  func.func @transform_4(%arg0: i32) -> (i32, i32) {
    %c0_i32 = arith.constant 0 : i32
    %c0_i32_0 = arith.constant 0 : i32
    %c0_i32_1 = arith.constant 0 : i32
    return %c0_i32, %c0_i32_0 : i32, i32
  }
  func.func @transform_5(%arg0: i32) -> (i32, i32) {
    %c0_i32 = arith.constant 0 : i32
    %c0_i32_0 = arith.constant 0 : i32
    %c0_i32_1 = arith.constant 0 : i32
    return %c0_i32, %c0_i32_0 : i32, i32
  }
  func.func @transform_6(%arg0: i32) -> (i32, i32) {
    %c0_i32 = arith.constant 0 : i32
    %c0_i32_0 = arith.constant 0 : i32
    %c0_i32_1 = arith.constant 0 : i32
    return %c0_i32, %c0_i32_0 : i32, i32
  }
  func.func @transform_7(%arg0: i32) -> (i32, i32) {
    %c0_i32 = arith.constant 0 : i32
    %c0_i32_0 = arith.constant 0 : i32
    %c0_i32_1 = arith.constant 0 : i32
    return %c0_i32, %c0_i32_0 : i32, i32
  }
  func.func @transform_8(%arg0: i32) -> (i32, i32) {
    %c0_i32 = arith.constant 0 : i32
    %c0_i32_0 = arith.constant 0 : i32
    %c0_i32_1 = arith.constant 0 : i32
    return %c0_i32, %c0_i32_0 : i32, i32
  }
  func.func @transform_9(%arg0: i32) -> (i32, i32) {
    %c0_i32 = arith.constant 0 : i32
    %c0_i32_0 = arith.constant 0 : i32
    return %arg0, %c0_i32 : i32, i32
  }
}

</mosaic_0001>

<bundles_post_ra>
// kernel: neural_network_forward.1
= control target key start
LH: loop header
LB: loop body
LE: loop exit
PB: predicated region body
PF: predicated region fallthrough
CT: control target
= control target key end

     0   :  { %14 = vsyncpa [#allocation3], 0  ;;  %s661_s30 = smov [#allocation2]   ;;  %s837_s0 = inlined_call_operand.vmem [shape: bf16[16,32], index: 0, kind: input, shape index: {}]   ;;  %s838_s1 = inlined_call_operand.vmem [shape: bf16[32,128], index: 1, kind: input, shape index: {}]   ;;  %s839_s2 = inlined_call_operand.vmem [shape: f32[1,128], index: 2, kind: input, shape index: {}]   ;;  %s840_s3 = inlined_call_operand.vmem [shape: bf16[128,128], index: 3, kind: input, shape index: {}]   ;;  %s841_s4 = inlined_call_operand.vmem [shape: f32[1,128], index: 4, kind: input, shape index: {}]   ;;  %s842_s5 = inlined_call_operand.hbm [shape: bf16[128,128], index: 5, kind: input, shape index: {}]   ;;  %s843_s6 = inlined_call_operand.vmem [shape: f32[1,128], index: 6, kind: input, shape index: {}]   ;;  %s844_s7 = inlined_call_operand.vmem [shape: bf16[128,4], index: 7, kind: input, shape index: {}]   ;;  %s845_s8 = inlined_call_operand.vmem [shape: f32[1,4], index: 8, kind: input, shape index: {}]   ;;  %s846_s9 = inlined_call_operand.vmem [shape: f32[16,4], index: 9, kind: output, shape index: {}]  }
   0x1   :  { %s30_s10 = sshll.u32 %s661_s30, 4  ;;  %s637_s13 = scalar_lea.hbm %s842_s5, 1024  ;;  %s31_s10 = int_to_ptr.vmem [resolvable:$true] %s30_s10 }
   0x2   :  { %p638_p0 = scmp.ne.s32.totalorder %s842_s5, %s637_s13  ;;  %p641_p1 = scmp.lt.u32.totalorder %s637_s13, %s842_s5 }
   0x4   :  { %p643_p2 = pnand %p641_p1, %p638_p0 }
   0x6   :  { %646 = shalt.err (!%p643_p2)
}
   0x7   :  { %s647_s18 = scalar_lea.vmem %s31_s10, 1024  ;;  %p652_p4 = scmp.lt.s32.totalorder %s31_s10, %s31_s10 }
   0x8   :  { %p648_p3 = scmp.ne.s32.totalorder %s31_s10, %s647_s18  ;;  %p653_p5 = scmp.lt.s32.totalorder %s647_s18, %s647_s18 }
   0xa   :  { %p654_p6 = por %p653_p5, %p652_p4 }
   0xc   :  { %p655_p7 = pnand %p654_p6, %p648_p3 }
   0xe   :  { %658 = shalt.err (!%p655_p7)
}
   0xf   :  { %s662_s19 = smov 64   ;;  %s663_s20 = smov 4  }
  0x10   :  { %36 = dma.hbm_to_vmem [thread:$0]  %s842_s5, 1024, %s31_s10, [#allocation3], %s662_s19, %s662_s19, %s663_s20  }
  0x11   :  { %659 = dma.done.wait [#allocation3], 1024  }
  0x12   :  { %660 = vsyncadd [#allocation3], 4294966272  ;;  %v664_v0 = vmov 0.0   ;;  %vm665_vm0 = vmmov 0   ;;  %v610_v1 = vld [vmem:[%s838_s1] sm:$0xff]   ;;  %v611_v2 = vld [vmem:[%s838_s1 + $0x8] sm:$0xff]  }
  0x13   :  { %537 = vmatprep.subr.bf16.mxu0 %v664_v0  ;;  %541 = vmatprep.mubr.msk.bf16.mxu0 %vm665_vm0, %v664_v0  ;;  %v613_v3 = vld [vmem:[%s840_s3] sm:$0xff]   ;;  %v614_v5 = vld [vmem:[%s840_s3 + $0x8] sm:$0xff]   ;;  %vm77_vm1 = vcmask 261120   ;;  %v615_v6 = vld [vmem:[%s840_s3 + $0x10] sm:$0xff]   ;;  %vm467_vm2 = vcmask 31744  }
  0x14   :  { %545 = vmatprep.subr.bf16.mxu1 %v664_v0  ;;  %561 = vmatprep.mubr.msk.bf16.mxu1 %vm665_vm0, %v664_v0  ;;  %v612_v4 = vld [vmem:[%s837_s0] sm:$0xff]   ;;  %v616_v7 = vld [vmem:[%s840_s3 + $0x18] sm:$0xff]   ;;  %v618_v9 = vld [vmem:[%s840_s3 + $0x28] sm:$0xff]  }
  0x15   :  { %538 = vmatpush3.bf16.msra.mxu0 %v610_v1  ;;  %546 = vmatpush3.bf16.msra.mxu1 %v613_v3  ;;  %v617_v8 = vld [vmem:[%s840_s3 + $0x20] sm:$0xff]   ;;  %v619_v10 = vld [vmem:[%s840_s3 + $0x30] sm:$0xff]   ;;  %v620_v11 = vld [vmem:[%s840_s3 + $0x38] sm:$0xff]  }
  0x16   :  { %539 = vmatprep.subr.bf16.mxu0 %v664_v0  ;;  %547 = vmatprep.subr.bf16.mxu1 %v664_v0  ;;  %v621_v12 = vld [vmem:[#allocation2] sm:$0xff]   ;;  %v622_v13 = vld [vmem:[#allocation2 + $0x8] sm:$0xff]   ;;  %v623_v14 = vld [vmem:[#allocation2 + $0x10] sm:$0xff]  }
  0x17   :  { %v624_v15 = vld [vmem:[#allocation2 + $0x18] sm:$0xff]   ;;  %v625_v16 = vld [vmem:[#allocation2 + $0x20] sm:$0xff]   ;;  %v626_v17 = vld [vmem:[#allocation2 + $0x28] sm:$0xff]  }
  0x18   :  { %v475_v18 = vld [vmem:[%s839_s2] ss:$0 sm:$0xff]  ;;  %v627_v28 = vld [vmem:[#allocation2 + $0x30] sm:$0xff]   ;;  %v628_v29 = vld [vmem:[#allocation2 + $0x38] sm:$0xff]  }
  0x19   :  { %540 = vmatpush3.bf16.msra.mxu0 %v611_v2  ;;  %548 = vmatpush3.bf16.msra.mxu1 %v614_v5  ;;  %v629_v30 = vld [vmem:[%s844_s7] sm:$0xff]   ;;  %v630_v31 = vld [vmem:[%s844_s7 + $0x8] sm:$0xff]   ;;  %v631_v32 = vld [vmem:[%s844_s7 + $0x10] sm:$0xff]  }
  0x1a   :  { %565 = vmatprep.subr.bf16.mxu0 %v664_v0  ;;  %549 = vmatprep.subr.bf16.mxu1 %v664_v0  ;;  %v632_v33 = vld [vmem:[%s844_s7 + $0x18] sm:$0xff]   ;;  %v633_v34 = vld [vmem:[%s844_s7 + $0x20] sm:$0xff]   ;;  %v634_v35 = vld [vmem:[%s844_s7 + $0x28] sm:$0xff]  }
  0x1b   :  { %v480_v36 = vld [vmem:[%s841_s4] ss:$0 sm:$0xff]  ;;  %v635_v46 = vld [vmem:[%s844_s7 + $0x30] sm:$0xff]   ;;  %v636_v47 = vld [vmem:[%s844_s7 + $0x38] sm:$0xff]  }
  0x1c   :  { %542 = vmatmul.mubr.msk.bf16.vlgmr.msra.gmra.mrb[0].mxu0 %vm77_vm1, %v612_v4  ;;  %v489_v48 = vld [vmem:[%s843_s6] ss:$0 sm:$0xff] }
  0x1d   :  { %581 = vmatprep.mubr.msk.bf16.mxu0 %vm665_vm0, %v664_v0  ;;  %550 = vmatpush3.bf16.msra.mxu1 %v615_v6  ;;  %v498_v58 = vld [vmem:[%s845_s8] ss:$0 sm:$0xff] }
  0x1e   :  { %551 = vmatprep.subr.bf16.mxu1 %v664_v0  ;;  %566 = vmatpush3.bf16.msra.mxu0 %v621_v12 }
  0x1f   :  { %567 = vmatprep.subr.bf16.mxu0 %v664_v0 }
  0x21   :  { %552 = vmatpush3.bf16.msra.mxu1 %v616_v7 }
  0x22   :  { %553 = vmatprep.subr.bf16.mxu1 %v664_v0  ;;  %568 = vmatpush3.bf16.msra.mxu0 %v622_v13 }
  0x23   :  { %569 = vmatprep.subr.bf16.mxu0 %v664_v0 }
  0x25   :  { %554 = vmatpush3.bf16.msra.mxu1 %v617_v8 }
  0x26   :  { %555 = vmatprep.subr.bf16.mxu1 %v664_v0  ;;  %570 = vmatpush3.bf16.msra.mxu0 %v623_v14 }
  0x27   :  { %571 = vmatprep.subr.bf16.mxu0 %v664_v0 }
  0x29   :  { %556 = vmatpush3.bf16.msra.mxu1 %v618_v9 }
  0x2a   :  { %557 = vmatprep.subr.bf16.mxu1 %v664_v0  ;;  %572 = vmatpush3.bf16.msra.mxu0 %v624_v15 }
  0x2b   :  { %573 = vmatprep.subr.bf16.mxu0 %v664_v0 }
  0x2d   :  { %558 = vmatpush3.bf16.msra.mxu1 %v619_v10 }
  0x2e   :  { %559 = vmatprep.subr.bf16.mxu1 %v664_v0  ;;  %574 = vmatpush3.bf16.msra.mxu0 %v625_v16 }
  0x2f   :  { %575 = vmatprep.subr.bf16.mxu0 %v664_v0 }
  0x31   :  { %560 = vmatpush3.bf16.msra.mxu1 %v620_v11 }
  0x32   :  { %585 = vmatprep.subr.bf16.mxu1 %v664_v0  ;;  %576 = vmatpush3.bf16.msra.mxu0 %v626_v17 }
  0x33   :  { %577 = vmatprep.subr.bf16.mxu0 %v664_v0 }
  0x36   :  { %578 = vmatpush3.bf16.msra.mxu0 %v627_v28 }
  0x37   :  { %579 = vmatprep.subr.bf16.mxu0 %v664_v0 }
  0x3a   :  { %580 = vmatpush3.bf16.msra.mxu0 %v628_v29 }
  0xef   :  { %v115_v19 = vpop.f32.mrb[0].mxu0 }
  0xf0   :  { %v116_v20 = vadd.f32 %v475_v18, %v115_v19  ;;  %v543_v21 = vpop.f32.mrb[1].mxu0 }
  0xf1   :  { %v118_v22 = vpop.f32.mrb[2].mxu0 }
  0xf2   :  { %v119_v23 = vadd.f32 %v475_v18, %v118_v22  ;;  %v544_v24 = vpop.f32.mrb[3].mxu0  ;;  %v122_v25 = vmax.f32 %v116_v20, 0.0 }
  0xf4   :  { %v123_v26 = vmax.f32 %v119_v23, 0.0 }
  0xf6   :  { %v124_v27 = vpack.c.bf16 %v123_v26, %v122_v25 }
  0xf8   :  { %562 = vmatmul.mubr.bf16.vlgmr.msra.gmra.mrb[0].mxu1 %v124_v27 }
  0xf9   :  { %601 = vmatprep.mubr.msk.bf16.mxu1 %vm665_vm0, %v664_v0  ;;  %586 = vmatpush3.bf16.msra.mxu1 %v629_v30 }
  0xfa   :  { %587 = vmatprep.subr.bf16.mxu1 %v664_v0 }
  0xfd   :  { %588 = vmatpush3.bf16.msra.mxu1 %v630_v31 }
  0xfe   :  { %589 = vmatprep.subr.bf16.mxu1 %v664_v0 }
 0x101   :  { %590 = vmatpush3.bf16.msra.mxu1 %v631_v32 }
 0x102   :  { %591 = vmatprep.subr.bf16.mxu1 %v664_v0 }
 0x105   :  { %592 = vmatpush3.bf16.msra.mxu1 %v632_v33 }
 0x106   :  { %593 = vmatprep.subr.bf16.mxu1 %v664_v0 }
 0x109   :  { %594 = vmatpush3.bf16.msra.mxu1 %v633_v34 }
 0x10a   :  { %595 = vmatprep.subr.bf16.mxu1 %v664_v0 }
 0x10d   :  { %596 = vmatpush3.bf16.msra.mxu1 %v634_v35 }
 0x10e   :  { %597 = vmatprep.subr.bf16.mxu1 %v664_v0 }
 0x111   :  { %598 = vmatpush3.bf16.msra.mxu1 %v635_v46 }
 0x112   :  { %599 = vmatprep.subr.bf16.mxu1 %v664_v0 }
 0x115   :  { %600 = vmatpush3.bf16.msra.mxu1 %v636_v47 }
 0x1cb   :  { %v230_v37 = vpop.f32.mrb[0].mxu1 }
 0x1cc   :  { %v231_v38 = vadd.f32 %v480_v36, %v230_v37  ;;  %v563_v39 = vpop.f32.mrb[1].mxu1 }
 0x1cd   :  { %v233_v40 = vpop.f32.mrb[2].mxu1 }
 0x1ce   :  { %v234_v41 = vadd.f32 %v480_v36, %v233_v40  ;;  %v564_v42 = vpop.f32.mrb[3].mxu1  ;;  %v237_v43 = vmax.f32 %v231_v38, 0.0 }
 0x1d0   :  { %v238_v44 = vmax.f32 %v234_v41, 0.0 }
 0x1d2   :  { %v239_v45 = vpack.c.bf16 %v238_v44, %v237_v43 }
 0x1d4   :  { %582 = vmatmul.mubr.bf16.vlgmr.msra.gmra.mrb[4].mxu0 %v239_v45 }
 0x2a7   :  { %v345_v49 = vpop.f32.mrb[4].mxu0 }
 0x2a8   :  { %v346_v50 = vadd.f32 %v489_v48, %v345_v49  ;;  %v583_v51 = vpop.f32.mrb[5].mxu0 }
 0x2a9   :  { %v348_v52 = vpop.f32.mrb[6].mxu0 }
 0x2aa   :  { %v349_v53 = vadd.f32 %v489_v48, %v348_v52  ;;  %v584_v54 = vpop.f32.mrb[7].mxu0  ;;  %v352_v55 = vmax.f32 %v346_v50, 0.0 }
 0x2ac   :  { %v353_v56 = vmax.f32 %v349_v53, 0.0 }
 0x2ae   :  { %v354_v57 = vpack.c.bf16 %v353_v56, %v352_v55 }
 0x2b0   :  { %602 = vmatmul.mubr.bf16.vlgmr.msra.gmra.mrb[4].mxu1 %v354_v57 }
 0x383   :  { %v460_v59 = vpop.f32.mrb[4].mxu1 }
 0x384   :  { %v461_v60 = vadd.f32 %v498_v58, %v460_v59  ;;  %v603_v61 = vpop.f32.mrb[5].mxu1 }
 0x385   :  { %v463_v62 = vpop.f32.mrb[6].mxu1 }
 0x386   :  { %468 = vst.msk [vmem:[%s846_s9] sm:$0xff] %vm467_vm2, %v461_v60  ;;  %v464_v63 = vadd.f32 %v498_v58, %v463_v62  ;;  %v604_v0 = vpop.f32.mrb[7].mxu1 }
 0x388   :  { %469 = vst.msk [vmem:[%s846_s9 + $0x8] sm:$0xff] %vm467_vm2, %v464_v63 }
 0x389   :  { %474 = vsyncpa [#allocation3], 1 }

</bundles_post_ra>
